<compile_context>
chip_gen: v6e
topology: v6e:2x2x1
jax: 0.10.0
libtpu: 0.0.40
codegen_flags: <defaults>
</compile_context>

<pallas_src>
import jax
import jax.numpy as jnp
from jax.experimental import pallas as pl
from jax.experimental.pallas import tpu as pltpu


def _affine_kernel(x_ref, scale_ref, shift_ref, o_ref):
    # x: (tile_n, C); scale/shift: (1, C) broadcast over rows.
    o_ref[...] = x_ref[...] * scale_ref[...] + shift_ref[...]


def _choose_tile_n(N, C, itemsize, max_block_bytes):
    """Rows per block: as large as the per-block byte budget allows, a
    multiple of 8, but keep >= 2 grid steps when the batch allows (megacore)."""
    rows_cap = max(8, (max_block_bytes // max(1, C * itemsize)) // 8 * 8)
    if N >= 16:
        half = max(8, (pl.cdiv(N, 2) + 7) // 8 * 8)
        rows_cap = min(rows_cap, half)
    n_rounded = (N + 7) // 8 * 8
    return max(8, min(rows_cap, n_rounded))


def unmixtns1d_forward(x, source_mean, source_var, weight, bias, eps=1e-5,
                       max_block_bytes=6 << 20, min_pallas_bytes=1 << 18,
                       force_pallas=False):
    """x: (N, C); params: (C,). Returns (N, C) with the same dtype as x."""
    N, C = x.shape
    itemsize = jnp.dtype(x.dtype).itemsize

    # Fold the four per-channel params into scale/shift (O(C) wrapper work).
    scale_1d = weight * jax.lax.rsqrt(source_var.astype(jnp.float32) + eps)
    shift_1d = bias - source_mean * scale_1d
    scale = scale_1d.reshape(1, C).astype(x.dtype)
    shift = shift_1d.reshape(1, C).astype(x.dtype)

    # Tiny problems: let XLA fuse the elementwise op instead of paying a
    # pallas_call's launch/pipeline overhead.
    if (not force_pallas) and (N * C * itemsize < min_pallas_bytes):
        return x * scale + shift

    tile_n = _choose_tile_n(N, C, itemsize, max_block_bytes)
    n_blocks = pl.cdiv(N, tile_n)
    n_pad = n_blocks * tile_n
    x_in = x if n_pad == N else jnp.pad(x, ((0, n_pad - N), (0, 0)))

    # Lane-dense blocks: full C on the lane axis, tile over the batch axis.
    x_spec = pl.BlockSpec((tile_n, C), lambda i: (i, 0))
    p_spec = pl.BlockSpec((1, C), lambda i: (0, 0))   # constant -> resident

    # VMEM budget: double-buffered input + output blocks + tiny param rows,
    # with headroom, clamped for v7x (64 MiB physical per TC).
    block_bytes = tile_n * C * itemsize
    vmem_bytes = 4 * block_bytes + 8 * C * itemsize + (2 << 20)
    vmem_bytes = int(min(48 << 20, max(16 << 20, vmem_bytes)))

    out = pl.pallas_call(
        _affine_kernel,
        out_shape=jax.ShapeDtypeStruct((n_pad, C), x.dtype),
        grid_spec=pltpu.PrefetchScalarGridSpec(
            num_scalar_prefetch=0,
            grid=(n_blocks,),
            in_specs=[x_spec, p_spec, p_spec],
            out_specs=x_spec,
        ),
        compiler_params=pltpu.CompilerParams(
            dimension_semantics=("parallel",),
            vmem_limit_bytes=vmem_bytes),
    )(x_in, scale, shift)

    return out if n_pad == N else out[:N]


def unmixtns1d_ref(x, source_mean, source_var, weight, bias, eps=1e-5):
    mean = source_mean[None, :]
    var = source_var[None, :]
    xn = (x - mean) / jnp.sqrt(var + eps)
    return xn * weight[None, :] + bias[None, :]


if __name__ == "__main__":
    key = jax.random.PRNGKey(0)
    k_x, k_m, k_v, k_w, k_b = jax.random.split(key, 5)

    # Small, ragged batch (exercises the padding path). C = 128 keeps the
    # channel axis exactly one lane width.
    N, C = 12, 128
    eps = 1e-5

    # Deterministic synthetic bn_layer parameters (shapes from __init__).
    x = jax.random.normal(k_x, (N, C), dtype=jnp.float32)
    source_mean = jax.random.normal(k_m, (C,), dtype=jnp.float32) * 0.5
    source_var = jax.random.uniform(k_v, (C,), dtype=jnp.float32,
                                    minval=0.5, maxval=1.5)
    weight = jax.random.normal(k_w, (C,), dtype=jnp.float32) * 0.1 + 1.0
    bias = jax.random.normal(k_b, (C,), dtype=jnp.float32) * 0.1

    # Note: BaseNormLayer's running_means_mat / running_vars_mat (K components
    # + injected noise) are never read by UnMixTNS1d.forward, so they are not
    # inputs to the kernel.

    out = unmixtns1d_forward(x, source_mean, source_var, weight, bias,
                             eps=eps, force_pallas=True)
    out = jax.block_until_ready(out)

    ref = unmixtns1d_ref(x, source_mean, source_var, weight, bias, eps=eps)
    assert out.shape == (N, C)
    assert jnp.allclose(out, ref, atol=1e-5, rtol=1e-5), "mismatch vs reference"

    print("KERNEL_OK")
</pallas_src>

<mosaic_0001>
module attributes {stable_mosaic.version = 11 : i64} {
  func.func @_affine_kernel(%arg0: i32, %arg1: memref<16x128xf32, #tpu.memory_space<vmem>>, %arg2: memref<1x128xf32, #tpu.memory_space<vmem>>, %arg3: memref<1x128xf32, #tpu.memory_space<vmem>>, %arg4: memref<16x128xf32, #tpu.memory_space<vmem>>) attributes {dimension_semantics = [#tpu.dimension_semantics<parallel>], iteration_bounds = array<i64: 1>, scalar_prefetch = 0 : i64, scratch_operands = 0 : i64, tpu.core_type = #tpu.core_type<tc>, window_params = [{transform_indices = @transform_0, window_bounds = array<i64: 16, 128>}, {pipeline_mode = #tpu.pipeline_mode<synchronous>, transform_indices = @transform_1, window_bounds = array<i64: 1, 128>}, {pipeline_mode = #tpu.pipeline_mode<synchronous>, transform_indices = @transform_2, window_bounds = array<i64: 1, 128>}, {transform_indices = @transform_3, window_bounds = array<i64: 16, 128>}]} {
    %c0 = arith.constant 0 : index
    %c0_0 = arith.constant 0 : index
    %0 = vector.load %arg1[%c0, %c0_0] : memref<16x128xf32, #tpu.memory_space<vmem>>, vector<16x128xf32>
    %c0_1 = arith.constant 0 : index
    %c0_2 = arith.constant 0 : index
    %1 = vector.load %arg2[%c0_1, %c0_2] : memref<1x128xf32, #tpu.memory_space<vmem>>, vector<1x128xf32>
    %2 = vector.broadcast %1 : vector<1x128xf32> to vector<16x128xf32>
    %3 = arith.mulf %0, %2 : vector<16x128xf32>
    %c0_3 = arith.constant 0 : index
    %c0_4 = arith.constant 0 : index
    %4 = vector.load %arg3[%c0_3, %c0_4] : memref<1x128xf32, #tpu.memory_space<vmem>>, vector<1x128xf32>
    %5 = vector.broadcast %4 : vector<1x128xf32> to vector<16x128xf32>
    %6 = arith.addf %3, %5 : vector<16x128xf32>
    %c0_5 = arith.constant 0 : index
    %c0_6 = arith.constant 0 : index
    %7 = vector.load %arg4[%c0_5, %c0_6] : memref<16x128xf32, #tpu.memory_space<vmem>>, vector<16x128xf32>
    tpu.vector_store %arg4[%c0_5, %c0_6], %6 {strides = array<i32>} : memref<16x128xf32, #tpu.memory_space<vmem>>, vector<16x128xf32>,
    return
  }
  func.func @transform_0(%arg0: i32) -> (i32, i32) {
    %c0_i32 = arith.constant 0 : i32
    %c0_i32_0 = arith.constant 0 : i32
    return %arg0, %c0_i32 : i32, i32
  }
  func.func @transform_1(%arg0: i32) -> (i32, i32) {
    %c0_i32 = arith.constant 0 : i32
    %c0_i32_0 = arith.constant 0 : i32
    %c0_i32_1 = arith.constant 0 : i32
    return %c0_i32, %c0_i32_0 : i32, i32
  }
  func.func @transform_2(%arg0: i32) -> (i32, i32) {
    %c0_i32 = arith.constant 0 : i32
    %c0_i32_0 = arith.constant 0 : i32
    %c0_i32_1 = arith.constant 0 : i32
    return %c0_i32, %c0_i32_0 : i32, i32
  }
  func.func @transform_3(%arg0: i32) -> (i32, i32) {
    %c0_i32 = arith.constant 0 : i32
    %c0_i32_0 = arith.constant 0 : i32
    return %arg0, %c0_i32 : i32, i32
  }
}

</mosaic_0001>

<bundles_post_ra>
// kernel: tpu_custom_call.1
= control target key start
LH: loop header
LB: loop body
LE: loop exit
PB: predicated region body
PF: predicated region fallthrough
CT: control target
= control target key end

     0   :  { %8 = vsyncpa [#allocation3], 0  ;;  %s154_s0 = inlined_call_operand.hbm [shape: f32[16,128], index: 0, kind: input, shape index: {}]   ;;  %s155_s1 = inlined_call_operand.vmem [shape: f32[1,128], index: 1, kind: input, shape index: {}]   ;;  %s156_s2 = inlined_call_operand.vmem [shape: f32[1,128], index: 2, kind: input, shape index: {}]   ;;  %s157_s3 = inlined_call_operand.hbm [shape: f32[16,128], index: 3, kind: output, shape index: {}]  }
   0x1   :  { %9 = vsyncpa [#allocation4], 0  ;;  %s118_s12 = smov [#allocation2]  }
   0x2   :  { %s15_s13 = sshll.u32 %s118_s12, 4  ;;  %s16_s13 = int_to_ptr.vmem [resolvable:$true] %s15_s13 }
   0x3   :  { %s82_s14 = scalar_lea.vmem %s16_s13, 256  ;;  %p87_p1 = scmp.lt.s32.totalorder %s16_s13, %s16_s13 }
   0x4   :  { %p83_p0 = scmp.ne.s32.totalorder %s16_s13, %s82_s14  ;;  %p88_p2 = scmp.lt.s32.totalorder %s82_s14, %s82_s14 }
   0x6   :  { %p89_p3 = por %p88_p2, %p87_p1 }
   0x8   :  { %p90_p4 = pnand %p89_p3, %p83_p0 }
   0xa   :  { %93 = shalt.err (!%p90_p4)
}
   0xb   :  { %s119_s15 = smov 128   ;;  %s120_s16 = smov 8  }
   0xc   :  { %21 = dma.hbm_to_vmem [thread:$0]  %s154_s0, 256, %s16_s13, [#allocation3], %s119_s15, %s119_s15, %s120_s16  }
   0xd   :  { %114 = dma.done.wait [#allocation3], 256  }
   0xe   :  { %115 = vsyncadd [#allocation3], 4294967040  ;;  %v29_v0 = vld [vmem:[#allocation2] sm:$0xff]  ;;  %v30_v4 = vld [vmem:[#allocation2 + $0x8] sm:$0xff]  ;;  %s121_s23 = smov [#allocation5]  }
   0xf   :  { %v68_v1 = vld [vmem:[%s155_s1] ss:$0 sm:$0xff]  ;;  %s56_s24 = sshll.u32 %s121_s23, 4  ;;  %s57_s24 = int_to_ptr.vmem [resolvable:$true] %s56_s24 }
  0x10   :  { %v69_v2 = vld [vmem:[%s156_s2] ss:$0 sm:$0xff]  ;;  %v38_v3 = vmul.f32 %v68_v1, %v29_v0  ;;  %v39_v5 = vmul.f32 %v68_v1, %v30_v4  ;;  %s94_s0 = scalar_lea.vmem %s57_s24, 256  ;;  %p99_p6 = scmp.lt.s32.totalorder %s57_s24, %s57_s24 }
  0x11   :  { %p95_p5 = scmp.ne.s32.totalorder %s57_s24, %s94_s0  ;;  %p100_p7 = scmp.lt.s32.totalorder %s94_s0, %s94_s0 }
  0x12   :  { %v47_v6 = vadd.f32 %v69_v2, %v38_v3  ;;  %v48_v7 = vadd.f32 %v69_v2, %v39_v5 }
  0x13   :  { %p101_p8 = por %p100_p7, %p99_p6 }
  0x14   :  { %49 = vst [vmem:[#allocation5] sm:$0xff] %v47_v6  ;;  %50 = vst [vmem:[#allocation5 + $0x8] sm:$0xff] %v48_v7 }
  0x15   :  { %p102_p9 = pnand %p101_p8, %p95_p5 }
  0x17   :  { %105 = shalt.err (!%p102_p9)
}
  0x18   :  { %62 = dma.vmem_to_hbm [thread:$0]  %s57_s24, 256, %s157_s3, [#allocation4], %s119_s15, %s119_s15, %s120_s16  }
  0x19   :  { %116 = dma.done.wait [#allocation4], 256  }
  0x1a   :  { %117 = vsyncadd [#allocation4], 4294967040 }
  0x1b   :  { %66 = vsyncpa [#allocation3], 1 }
  0x1c   :  { %67 = vsyncpa [#allocation4], 1 }

</bundles_post_ra>
